<compile_context>
chip_gen: v5e
topology: v5e:2x2
jax: 0.10.0
libtpu: 0.0.40
codegen_flags: <defaults>
</compile_context>

<pallas_src>
import jax
import jax.numpy as jnp
from jax.experimental import pallas as pl
from jax.experimental.pallas import tpu as pltpu

_LANE_CHOICES = (1024, 512, 256, 128)  # lane-dense last dims (multiples of 128)
_MAX_BLOCK_ROWS = 512                  # <=2 MiB f32 tile at 1024 lanes
_MIN_BLOCK_ROWS = 64                   # keep per-step overhead negligible
_TARGET_GRID_STEPS = 8                 # pipeline depth + megacore sharding on v7x
_SMALL_BYPASS_ELEMS = 256 * 1024       # below ~1 MiB f32, XLA's fused clip wins


def _clamp_kernel(img_ref, out_ref):
    # Elementwise clamp to [0, 1] on the VPU (purely HBM-bandwidth-bound).
    out_ref[...] = jnp.minimum(jnp.maximum(img_ref[...], 0.0), 1.0)


def _pick_lanes(total: int):
    for lanes in _LANE_CHOICES:
        if total % lanes == 0:
            return lanes
    return None


def _pick_block_rows(rows: int) -> int:
    # Aim for ~_TARGET_GRID_STEPS grid steps; block_rows a multiple of 8,
    # clamped to [_MIN_BLOCK_ROWS, _MAX_BLOCK_ROWS] and never above rows.
    target = max(1, rows // _TARGET_GRID_STEPS)
    block_rows = (target // 8) * 8
    block_rows = max(_MIN_BLOCK_ROWS, min(block_rows, _MAX_BLOCK_ROWS))
    # If rows is tiny, fall back to a full-dim block (always legal).
    return min(block_rows, rows)


def gnet_forward(image_g: jax.Array) -> jax.Array:
    """Pallas equivalent of GNet.forward(): clamp(image_g, 0, 1)."""
    total = image_g.size

    # Tiny parameters: launch overhead dominates; XLA's fused clip is optimal.
    if total < _SMALL_BYPASS_ELEMS:
        return jnp.clip(image_g, 0.0, 1.0)

    lanes = _pick_lanes(total)
    if lanes is None:
        # TODO(synk): sizes with no 128-multiple factor fall back to XLA's fused
        # clip rather than paying pad + slice HBM round trips.
        return jnp.clip(image_g, 0.0, 1.0)

    rows = total // lanes
    block_rows = _pick_block_rows(rows)
    grid = (pl.cdiv(rows, block_rows),)

    # Contiguous row-major reshape: no HBM copy.
    slab = image_g.reshape(rows, lanes)
    itemsize = jnp.dtype(slab.dtype).itemsize

    out_slab = pl.pallas_call(
        _clamp_kernel,
        out_shape=jax.ShapeDtypeStruct(slab.shape, slab.dtype),
        grid=grid,
        in_specs=[pl.BlockSpec((block_rows, lanes), lambda i: (i, 0))],
        out_specs=pl.BlockSpec((block_rows, lanes), lambda i: (i, 0)),
        compiler_params=pltpu.CompilerParams(
            dimension_semantics=("parallel",),
            vmem_limit_bytes=32 << 20,
        ),
        cost_estimate=pl.CostEstimate(
            flops=2 * total,                      # one max + one min per element
            transcendentals=0,
            bytes_accessed=2 * total * itemsize,  # read N + write N, no padding
        ),
    )(slab)

    return out_slab.reshape(image_g.shape)


class GNetPallas:
    """Mirrors the PyTorch GNet: holds image_g as a parameter, forward clamps it."""

    def __init__(self, image: jax.Array, a: float = 1e-20):
        # nn.Parameter(image.detach().clone()) -> just copy the array.
        # `a` is accepted but unused, exactly like the PyTorch module.
        self.image_g = jnp.asarray(image, dtype=jnp.float32)

    def forward(self) -> jax.Array:
        return gnet_forward(self.image_g)


if __name__ == "__main__":
    key = jax.random.PRNGKey(0)
    k_small, k_large = jax.random.split(key)

    # 1) Small NCHW demo image (matches the module's toy usage); takes the
    #    small-input bypass path. Values drawn outside [0,1] so clamp acts.
    image_small = jax.random.normal(k_small, (2, 4, 16, 16), dtype=jnp.float32) * 1.5 + 0.5
    net_small = GNetPallas(image_small)
    out_small = jax.block_until_ready(net_small.forward())
    ref_small = jnp.clip(net_small.image_g, 0.0, 1.0)
    assert out_small.shape == image_small.shape and out_small.dtype == jnp.float32
    assert jnp.allclose(out_small, ref_small), "mismatch vs reference clamp (small)"

    # 2) Typical style-transfer resolution; exercises the tiled Pallas path
    #    (rows=768, lanes=1024, block_rows=96, grid=(8,)).
    image_large = jax.random.normal(k_large, (1, 3, 512, 512), dtype=jnp.float32) * 1.5 + 0.5
    net_large = GNetPallas(image_large)
    out_large = jax.block_until_ready(net_large.forward())
    ref_large = jnp.clip(net_large.image_g, 0.0, 1.0)
    assert out_large.shape == image_large.shape and out_large.dtype == jnp.float32
    assert jnp.allclose(out_large, ref_large), "mismatch vs reference clamp (large)"

    print("KERNEL_OK")
</pallas_src>

<mosaic_0001>
module attributes {stable_mosaic.version = 11 : i64} {
  func.func @_clamp_kernel(%arg0: i32, %arg1: memref<96x1024xf32, #tpu.memory_space<vmem>>, %arg2: memref<96x1024xf32, #tpu.memory_space<vmem>>) attributes {dimension_semantics = [#tpu.dimension_semantics<parallel>], iteration_bounds = array<i64: 8>, scalar_prefetch = 0 : i64, scratch_operands = 0 : i64, tpu.core_type = #tpu.core_type<tc>, window_params = [{transform_indices = @transform_0, window_bounds = array<i64: 96, 1024>}, {transform_indices = @transform_1, window_bounds = array<i64: 96, 1024>}]} {
    %c0 = arith.constant 0 : index
    %c0_0 = arith.constant 0 : index
    %0 = vector.load %arg1[%c0, %c0_0] : memref<96x1024xf32, #tpu.memory_space<vmem>>, vector<96x1024xf32>
    %cst = arith.constant 0.000000e+00 : f32
    %1 = vector.broadcast %cst : f32 to vector<96x1024xf32>
    %2 = arith.maximumf %0, %1 : vector<96x1024xf32>
    %cst_1 = arith.constant 1.000000e+00 : f32
    %3 = vector.broadcast %cst_1 : f32 to vector<96x1024xf32>
    %4 = arith.minimumf %2, %3 : vector<96x1024xf32>
    %c0_2 = arith.constant 0 : index
    %c0_3 = arith.constant 0 : index
    %5 = vector.load %arg2[%c0_2, %c0_3] : memref<96x1024xf32, #tpu.memory_space<vmem>>, vector<96x1024xf32>
    tpu.vector_store %arg2[%c0_2, %c0_3], %4 {strides = array<i32>} : memref<96x1024xf32, #tpu.memory_space<vmem>>, vector<96x1024xf32>,
    return
  }
  func.func @transform_0(%arg0: i32) -> (i32, i32) {
    %c0_i32 = arith.constant 0 : i32
    %c0_i32_0 = arith.constant 0 : i32
    return %arg0, %c0_i32 : i32, i32
  }
  func.func @transform_1(%arg0: i32) -> (i32, i32) {
    %c0_i32 = arith.constant 0 : i32
    %c0_i32_0 = arith.constant 0 : i32
    return %arg0, %c0_i32 : i32, i32
  }
}

</mosaic_0001>

<bundles_post_ra>
// kernel: tpu_custom_call.1
= control target key start
LH: loop header
LB: loop body
LE: loop exit
PB: predicated region body
PF: predicated region fallthrough
CT: control target
= control target key end

     0   :  { %6 = vsyncpa [#allocation3], 0  ;;  %s1106_s0 = inlined_call_operand.hbm [shape: f32[768,1024], index: 0, kind: input, shape index: {}]   ;;  %s1107_s1 = inlined_call_operand.hbm [shape: f32[768,1024], index: 1, kind: output, shape index: {}]  }
   0x1   :  { %8 = vsyncpa [#allocation3 + $0x1], 0 }
   0x2   :  { %9 = vsyncpa [#allocation4], 0 }
   0x3   :  { %11 = vsyncpa [#allocation4 + $0x1], 0  ;;  %s794_s6 = smov 0   ;;  %s796_s7 = smov 0  }
   0x4   :  { %s798_s8 = smov 0   ;;  %s800_s9 = smov 0  }
   0x5 LB: > { %s815_s10 = sadd.s32 4294967295, %s778_s9   ;;  %s614_s11 = sadd.s32 4294967294, %s778_s9   ;;  %s778_s9 = sphi %s800_s9, %s1115_s9   ;;  %s774_s8 = sphi %s798_s8, %s1114_s8   ;;  %s770_s7 = sphi %s796_s7, %s1113_s7   ;;  %s766_s6 = sphi %s794_s6, %s1112_s6  }
   0x6   : > { %s819_s12 = sadd.s32 1, %s778_s9   ;;  %s24_s13 = sadd.s32 1, %s774_s8 }
   0x7   : > { %s21_s14 = ssub.s32 %s778_s9, %s819_s12  ;;  %p31_p0 = scmp.ne.s32.totalorder %s774_s8, %s770_s7 }
   0x8   : > { %p22_p1 = scmp.eq.s32.totalorder %s21_s14, 0  ;;  %p32_p2 = scmp.eq.s32.totalorder %s778_s9, 0 }
   0x9   : > { %p37_p3 = scmp.ne.s32.totalorder %s770_s7, %s766_s6  ;;  %p38_p4 = scmp.eq.s32.totalorder %s815_s10, 0 }
   0xa   : > { %s831_s15 = scalar_select %p22_p1, %s774_s8, %s24_s13  }
   0xb   : > { %p33_p5 = por %p32_p2, %p31_p0  ;;  %p833_p6 = por %p38_p4, %p37_p3 }
   0xc   : > { %p61_p7 = scmp.eq.s32.totalorder %s815_s10, 7  ;;  %p67_p8 = scmp.eq.s32.totalorder %s614_s11, 7 }
   0xd   : > { %p644_p9 = scmp.lt.s32.totalorder %s778_s9, 8  ;;  %s87_s19 = sand.u32 1, %s774_s8  }
   0xe   : > { %p839_p10 = por %p61_p7, %p31_p0  ;;  %p843_p11 = por %p67_p8, %p37_p3 }
   0xf   : > { %s628_s20 = smul.u32 768, %s778_s9  ;;  %p852_p12 = pnand %p644_p9, %p33_p5 }
  0x10   : > { %s630_s21 = smul.u32 768, %s87_s19  ;;  %s88_s29 = scalar_lea.sflag [#allocation3], %s87_s19 }
  0x11   : > { %s97_s24 = scalar_lea.hbm %s1106_s0, %s628_s20  ;;  %p686_p0 = pneg %p852_p12 }
  0x12   : > { %s98_s26 = sshll.u32 %s97_s24, 4  ;;  %s91_s27 = scalar_lea.vmem [#allocation2], %s630_s21  ;;  %s99_s26 = int_to_ptr.hbm [resolvable:$true] %s98_s26 }
  0x13   : > { %s100_s28 = sshll.u32 %s91_s27, 4  ;;  %s682_s30 = sshra.s32 %s99_s26, 4  ;;  %s101_s28 = int_to_ptr.vmem [resolvable:$true] %s100_s28  ;;  %s683_s30 = int_to_ptr.hbm [resolvable:$true] %s682_s30 }
  0x14   : > { %s684_s2 = scalar_lea.hbm %s683_s30, 768  ;;  %s689_s5 = scalar_lea.hbm %s1106_s0, 6144 }
  0x15   : > { %p685_p13 = scmp.ne.s32.totalorder %s683_s30, %s684_s2  ;;  %p690_p3 = scmp.lt.s32.totalorder %s683_s30, %s1106_s0 }
  0x16   : > { %p691_p4 = scmp.lt.s32.totalorder %s689_s5, %s684_s2 }
  0x17   : > { %p687_p1 = pnand %p686_p0, %p685_p13 }
  0x18   : > { %p692_p5 = por %p691_p4, %p690_p3 }
  0x19   : > { %p688_p2 = pneg %p687_p1 }
  0x1b   : > { %p693_p7 = pnand %p692_p5, %p688_p2 }
  0x1d   : > { %696 = shalt.err (!%p693_p7)
}
  0x1e   : > { %s780_s14 = smov 1024   ;;  %s781_s19 = smov 64  }
  0x1f   : > { %639 = dma.hbm_to_vmem [thread:$0]  (!%p852_p12), %s99_s26, 12288, %s101_s28, %s88_s29, %s780_s14, %s780_s14, %s781_s19  }
  0x20   : > { %p619_p8 = scmp.ge.s32.totalorder %s778_s9, 1  ;;  %p108_p9 = scmp.lt.s32.totalorder %s778_s9, 9 }
  0x22   : > { %p109_p13 = pnand %p619_p8, %p108_p9 }
  0x23   : > { %s869_s20 = sand.u32 (!%p109_p13), 1, %s770_s7  }
  0x24   : > { %112 = sbr.rel (%p109_p13) target bundleno = 146 (0x92), region = 24  ;;  %s115_s22 = scalar_lea.sflag (!%p109_p13), [#allocation3], %s869_s20 }
  0x25   : > { %s631_s21 = smul.u32 (!%p109_p13), 768, %s869_s20 }
  0x27   : > { %s873_s23 = scalar_lea.vmem (!%p109_p13), [#allocation2], %s631_s21 }
  0x29   : > { %757 = dma.done.wait (%p833_p6), %s115_s22, 12288  }
  0x2a   : > { %759 = vsyncadd (%p833_p6), %s115_s22, 4294955008  ;;  %v140_v0 = vld [vmem:[%s873_s23] sm:$0xff]  ;;  %v141_v1 = vld [vmem:[%s873_s23 + $0x8] sm:$0xff]  ;;  %s890_s16 = scalar_lea.vmem [#allocation5], %s631_s21  ;;  %s629_s24 = smul.u32 768, %s815_s10 }
  0x2b   : > { %v142_v2 = vld [vmem:[%s873_s23 + $0x10] sm:$0xff]  ;;  %v236_v3 = vmax.f32 %v140_v0, 0.0  ;;  %v237_v4 = vmax.f32 %v141_v1, 0.0  ;;  %v143_v6 = vld [vmem:[%s873_s23 + $0x18] sm:$0xff]  ;;  %v144_v7 = vld [vmem:[%s873_s23 + $0x20] sm:$0xff]  ;;  %s538_s27 = sshll.u32 %s890_s16, 4  ;;  %s539_s27 = int_to_ptr.vmem [resolvable:$true] %s538_s27 }
  0x2c   : > { %v238_v5 = vmax.f32 %v142_v2, 0.0  ;;  %v145_v8 = vld [vmem:[%s873_s23 + $0x28] sm:$0xff]  ;;  %v239_v9 = vmax.f32 %v143_v6, 0.0  ;;  %v240_v10 = vmax.f32 %v144_v7, 0.0  ;;  %v146_v12 = vld [vmem:[%s873_s23 + $0x30] sm:$0xff]  ;;  %v147_v13 = vld [vmem:[%s873_s23 + $0x38] sm:$0xff]  ;;  %s537_s26 = scalar_lea.hbm %s1107_s1, %s629_s24 }
  0x2d   : > { %v241_v11 = vmax.f32 %v145_v8, 0.0  ;;  %v148_v14 = vld [vmem:[%s873_s23 + $0x40] sm:$0xff]  ;;  %v332_v15 = vmin.f32 %v236_v3, 1.0  ;;  %v333_v16 = vmin.f32 %v237_v4, 1.0  ;;  %v242_v18 = vmax.f32 %v146_v12, 0.0  ;;  %v149_v19 = vld [vmem:[%s873_s23 + $0x48] sm:$0xff] }
  0x2e   : > { %v334_v17 = vmin.f32 %v238_v5, 1.0  ;;  %v335_v20 = vmin.f32 %v239_v9, 1.0  ;;  %v243_v21 = vmax.f32 %v147_v13, 0.0  ;;  %v150_v22 = vld [vmem:[%s873_s23 + $0x50] sm:$0xff]  ;;  %v336_v23 = vmin.f32 %v240_v10, 1.0  ;;  %v151_v25 = vld [vmem:[%s873_s23 + $0x58] sm:$0xff] }
  0x2f   : > { %428 = vst [vmem:[%s890_s16] sm:$0xff] %v332_v15  ;;  %v244_v24 = vmax.f32 %v148_v14, 0.0  ;;  %v337_v26 = vmin.f32 %v241_v11, 1.0  ;;  %v245_v27 = vmax.f32 %v149_v19, 0.0  ;;  %v152_v28 = vld [vmem:[%s873_s23 + $0x60] sm:$0xff]  ;;  %v338_v29 = vmin.f32 %v242_v18, 1.0  ;;  %v153_v31 = vld [vmem:[%s873_s23 + $0x68] sm:$0xff] }
  0x30   : > { %429 = vst [vmem:[%s890_s16 + $0x8] sm:$0xff] %v333_v16  ;;  %v246_v30 = vmax.f32 %v150_v22, 0.0  ;;  %v339_v32 = vmin.f32 %v243_v21, 1.0  ;;  %v247_v33 = vmax.f32 %v151_v25, 0.0  ;;  %v154_v34 = vld [vmem:[%s873_s23 + $0x70] sm:$0xff]  ;;  %v248_v36 = vmax.f32 %v152_v28, 0.0 }
  0x31   : > { %430 = vst [vmem:[%s890_s16 + $0x10] sm:$0xff] %v334_v17  ;;  %v340_v35 = vmin.f32 %v244_v24, 1.0  ;;  %v155_v37 = vld [vmem:[%s873_s23 + $0x78] sm:$0xff]  ;;  %v341_v38 = vmin.f32 %v245_v27, 1.0  ;;  %v249_v39 = vmax.f32 %v153_v31, 0.0  ;;  %v156_v40 = vld [vmem:[%s873_s23 + $0x80] sm:$0xff] }
  0x32   : > { %431 = vst [vmem:[%s890_s16 + $0x18] sm:$0xff] %v335_v20  ;;  %v342_v41 = vmin.f32 %v246_v30, 1.0  ;;  %v250_v42 = vmax.f32 %v154_v34, 0.0  ;;  %v157_v43 = vld [vmem:[%s873_s23 + $0x88] sm:$0xff]  ;;  %v343_v44 = vmin.f32 %v247_v33, 1.0  ;;  %v251_v45 = vmax.f32 %v155_v37, 0.0 }
  0x33   : > { %432 = vst [vmem:[%s890_s16 + $0x20] sm:$0xff] %v336_v23  ;;  %v158_v46 = vld [vmem:[%s873_s23 + $0x90] sm:$0xff]  ;;  %v344_v47 = vmin.f32 %v248_v36, 1.0  ;;  %v252_v48 = vmax.f32 %v156_v40, 0.0  ;;  %v159_v49 = vld [vmem:[%s873_s23 + $0x98] sm:$0xff]  ;;  %v345_v50 = vmin.f32 %v249_v39, 1.0 }
  0x34   : > { %433 = vst [vmem:[%s890_s16 + $0x28] sm:$0xff] %v337_v26  ;;  %v253_v51 = vmax.f32 %v157_v43, 0.0  ;;  %v160_v52 = vld [vmem:[%s873_s23 + $0xa0] sm:$0xff]  ;;  %v346_v53 = vmin.f32 %v250_v42, 1.0  ;;  %v254_v54 = vmax.f32 %v158_v46, 0.0  ;;  %v161_v55 = vld [vmem:[%s873_s23 + $0xa8] sm:$0xff] }
  0x35   : > { %434 = vst [vmem:[%s890_s16 + $0x30] sm:$0xff] %v338_v29  ;;  %v347_v56 = vmin.f32 %v251_v45, 1.0  ;;  %v255_v57 = vmax.f32 %v159_v49, 0.0  ;;  %v162_v58 = vld [vmem:[%s873_s23 + $0xb0] sm:$0xff]  ;;  %v348_v59 = vmin.f32 %v252_v48, 1.0  ;;  %v256_v60 = vmax.f32 %v160_v52, 0.0 }
  0x36   : > { %435 = vst [vmem:[%s890_s16 + $0x38] sm:$0xff] %v339_v32  ;;  %v163_v61 = vld [vmem:[%s873_s23 + $0xb8] sm:$0xff]  ;;  %v349_v62 = vmin.f32 %v253_v51, 1.0  ;;  %v257_v63 = vmax.f32 %v161_v55, 0.0  ;;  %v164_v0 = vld [vmem:[%s873_s23 + $0xc0] sm:$0xff]  ;;  %v350_v1 = vmin.f32 %v254_v54, 1.0 }
  0x37   : > { %436 = vst [vmem:[%s890_s16 + $0x40] sm:$0xff] %v340_v35  ;;  %v258_v2 = vmax.f32 %v162_v58, 0.0  ;;  %v165_v3 = vld [vmem:[%s873_s23 + $0xc8] sm:$0xff]  ;;  %v351_v4 = vmin.f32 %v255_v57, 1.0  ;;  %v259_v5 = vmax.f32 %v163_v61, 0.0  ;;  %v166_v6 = vld [vmem:[%s873_s23 + $0xd0] sm:$0xff] }
  0x38   : > { %437 = vst [vmem:[%s890_s16 + $0x48] sm:$0xff] %v341_v38  ;;  %v352_v7 = vmin.f32 %v256_v60, 1.0  ;;  %v260_v8 = vmax.f32 %v164_v0, 0.0  ;;  %v167_v9 = vld [vmem:[%s873_s23 + $0xd8] sm:$0xff]  ;;  %v353_v10 = vmin.f32 %v257_v63, 1.0  ;;  %v261_v11 = vmax.f32 %v165_v3, 0.0 }
  0x39   : > { %438 = vst [vmem:[%s890_s16 + $0x50] sm:$0xff] %v342_v41  ;;  %v168_v12 = vld [vmem:[%s873_s23 + $0xe0] sm:$0xff]  ;;  %v354_v13 = vmin.f32 %v258_v2, 1.0  ;;  %v262_v14 = vmax.f32 %v166_v6, 0.0  ;;  %v169_v15 = vld [vmem:[%s873_s23 + $0xe8] sm:$0xff]  ;;  %v355_v16 = vmin.f32 %v259_v5, 1.0 }
  0x3a   : > { %439 = vst [vmem:[%s890_s16 + $0x58] sm:$0xff] %v343_v44  ;;  %v263_v17 = vmax.f32 %v167_v9, 0.0  ;;  %v170_v18 = vld [vmem:[%s873_s23 + $0xf0] sm:$0xff]  ;;  %v356_v19 = vmin.f32 %v260_v8, 1.0  ;;  %v264_v20 = vmax.f32 %v168_v12, 0.0  ;;  %v171_v21 = vld [vmem:[%s873_s23 + $0xf8] sm:$0xff] }
  0x3b   : > { %440 = vst [vmem:[%s890_s16 + $0x60] sm:$0xff] %v344_v47  ;;  %v357_v22 = vmin.f32 %v261_v11, 1.0  ;;  %v265_v23 = vmax.f32 %v169_v15, 0.0  ;;  %v172_v24 = vld [vmem:[%s873_s23 + $0x100] sm:$0xff]  ;;  %v358_v25 = vmin.f32 %v262_v14, 1.0  ;;  %v266_v26 = vmax.f32 %v170_v18, 0.0 }
  0x3c   : > { %441 = vst [vmem:[%s890_s16 + $0x68] sm:$0xff] %v345_v50  ;;  %v173_v27 = vld [vmem:[%s873_s23 + $0x108] sm:$0xff]  ;;  %v359_v28 = vmin.f32 %v263_v17, 1.0  ;;  %v267_v29 = vmax.f32 %v171_v21, 0.0  ;;  %v174_v30 = vld [vmem:[%s873_s23 + $0x110] sm:$0xff]  ;;  %v360_v31 = vmin.f32 %v264_v20, 1.0 }
  0x3d   : > { %442 = vst [vmem:[%s890_s16 + $0x70] sm:$0xff] %v346_v53  ;;  %v268_v32 = vmax.f32 %v172_v24, 0.0  ;;  %v175_v33 = vld [vmem:[%s873_s23 + $0x118] sm:$0xff]  ;;  %v361_v34 = vmin.f32 %v265_v23, 1.0  ;;  %v269_v35 = vmax.f32 %v173_v27, 0.0  ;;  %v176_v36 = vld [vmem:[%s873_s23 + $0x120] sm:$0xff] }
  0x3e   : > { %443 = vst [vmem:[%s890_s16 + $0x78] sm:$0xff] %v347_v56  ;;  %v362_v37 = vmin.f32 %v266_v26, 1.0  ;;  %v270_v38 = vmax.f32 %v174_v30, 0.0  ;;  %v177_v39 = vld [vmem:[%s873_s23 + $0x128] sm:$0xff]  ;;  %v363_v40 = vmin.f32 %v267_v29, 1.0  ;;  %v271_v41 = vmax.f32 %v175_v33, 0.0 }
  0x3f   : > { %444 = vst [vmem:[%s890_s16 + $0x80] sm:$0xff] %v348_v59  ;;  %v178_v42 = vld [vmem:[%s873_s23 + $0x130] sm:$0xff]  ;;  %v364_v43 = vmin.f32 %v268_v32, 1.0  ;;  %v272_v44 = vmax.f32 %v176_v36, 0.0  ;;  %v179_v45 = vld [vmem:[%s873_s23 + $0x138] sm:$0xff]  ;;  %v365_v46 = vmin.f32 %v269_v35, 1.0 }
  0x40   : > { %445 = vst [vmem:[%s890_s16 + $0x88] sm:$0xff] %v349_v62  ;;  %v273_v47 = vmax.f32 %v177_v39, 0.0  ;;  %v180_v48 = vld [vmem:[%s873_s23 + $0x140] sm:$0xff]  ;;  %v366_v49 = vmin.f32 %v270_v38, 1.0  ;;  %v274_v50 = vmax.f32 %v178_v42, 0.0  ;;  %v181_v51 = vld [vmem:[%s873_s23 + $0x148] sm:$0xff] }
  0x41   : > { %446 = vst [vmem:[%s890_s16 + $0x90] sm:$0xff] %v350_v1  ;;  %v367_v52 = vmin.f32 %v271_v41, 1.0  ;;  %v275_v53 = vmax.f32 %v179_v45, 0.0  ;;  %v182_v54 = vld [vmem:[%s873_s23 + $0x150] sm:$0xff]  ;;  %v368_v55 = vmin.f32 %v272_v44, 1.0  ;;  %v276_v56 = vmax.f32 %v180_v48, 0.0 }
  0x42   : > { %447 = vst [vmem:[%s890_s16 + $0x98] sm:$0xff] %v351_v4  ;;  %v183_v57 = vld [vmem:[%s873_s23 + $0x158] sm:$0xff]  ;;  %v369_v58 = vmin.f32 %v273_v47, 1.0  ;;  %v277_v59 = vmax.f32 %v181_v51, 0.0  ;;  %v184_v60 = vld [vmem:[%s873_s23 + $0x160] sm:$0xff]  ;;  %v370_v61 = vmin.f32 %v274_v50, 1.0 }
  0x43   : > { %448 = vst [vmem:[%s890_s16 + $0xa0] sm:$0xff] %v352_v7  ;;  %v278_v62 = vmax.f32 %v182_v54, 0.0  ;;  %v185_v63 = vld [vmem:[%s873_s23 + $0x168] sm:$0xff]  ;;  %v371_v0 = vmin.f32 %v275_v53, 1.0  ;;  %v279_v1 = vmax.f32 %v183_v57, 0.0  ;;  %v186_v2 = vld [vmem:[%s873_s23 + $0x170] sm:$0xff] }
  0x44   : > { %449 = vst [vmem:[%s890_s16 + $0xa8] sm:$0xff] %v353_v10  ;;  %v372_v3 = vmin.f32 %v276_v56, 1.0  ;;  %v280_v4 = vmax.f32 %v184_v60, 0.0  ;;  %v187_v5 = vld [vmem:[%s873_s23 + $0x178] sm:$0xff]  ;;  %v373_v6 = vmin.f32 %v277_v59, 1.0  ;;  %v281_v7 = vmax.f32 %v185_v63, 0.0 }
  0x45   : > { %450 = vst [vmem:[%s890_s16 + $0xb0] sm:$0xff] %v354_v13  ;;  %v188_v8 = vld [vmem:[%s873_s23 + $0x180] sm:$0xff]  ;;  %v374_v9 = vmin.f32 %v278_v62, 1.0  ;;  %v282_v10 = vmax.f32 %v186_v2, 0.0  ;;  %v189_v11 = vld [vmem:[%s873_s23 + $0x188] sm:$0xff]  ;;  %v375_v12 = vmin.f32 %v279_v1, 1.0 }
  0x46   : > { %451 = vst [vmem:[%s890_s16 + $0xb8] sm:$0xff] %v355_v16  ;;  %v283_v13 = vmax.f32 %v187_v5, 0.0  ;;  %v190_v14 = vld [vmem:[%s873_s23 + $0x190] sm:$0xff]  ;;  %v376_v15 = vmin.f32 %v280_v4, 1.0  ;;  %v284_v16 = vmax.f32 %v188_v8, 0.0  ;;  %v191_v17 = vld [vmem:[%s873_s23 + $0x198] sm:$0xff] }
  0x47   : > { %452 = vst [vmem:[%s890_s16 + $0xc0] sm:$0xff] %v356_v19  ;;  %v377_v18 = vmin.f32 %v281_v7, 1.0  ;;  %v285_v19 = vmax.f32 %v189_v11, 0.0  ;;  %v192_v20 = vld [vmem:[%s873_s23 + $0x1a0] sm:$0xff]  ;;  %v378_v21 = vmin.f32 %v282_v10, 1.0  ;;  %v193_v23 = vld [vmem:[%s873_s23 + $0x1a8] sm:$0xff] }
  0x48   : > { %453 = vst [vmem:[%s890_s16 + $0xc8] sm:$0xff] %v357_v22  ;;  %v286_v22 = vmax.f32 %v190_v14, 0.0  ;;  %v379_v24 = vmin.f32 %v283_v13, 1.0  ;;  %v194_v26 = vld [vmem:[%s873_s23 + $0x1b0] sm:$0xff]  ;;  %v380_v27 = vmin.f32 %v284_v16, 1.0  ;;  %v195_v29 = vld [vmem:[%s873_s23 + $0x1b8] sm:$0xff] }
  0x49   : > { %454 = vst [vmem:[%s890_s16 + $0xd0] sm:$0xff] %v358_v25  ;;  %v287_v25 = vmax.f32 %v191_v17, 0.0  ;;  %v381_v30 = vmin.f32 %v285_v19, 1.0  ;;  %v196_v32 = vld [vmem:[%s873_s23 + $0x1c0] sm:$0xff]  ;;  %v197_v35 = vld [vmem:[%s873_s23 + $0x1c8] sm:$0xff]  ;;  %v198_v38 = vld [vmem:[%s873_s23 + $0x1d0] sm:$0xff] }
  0x4a   : > { %455 = vst [vmem:[%s890_s16 + $0xd8] sm:$0xff] %v359_v28  ;;  %v288_v28 = vmax.f32 %v192_v20, 0.0  ;;  %v382_v33 = vmin.f32 %v286_v22, 1.0  ;;  %v199_v41 = vld [vmem:[%s873_s23 + $0x1d8] sm:$0xff]  ;;  %v200_v44 = vld [vmem:[%s873_s23 + $0x1e0] sm:$0xff]  ;;  %v201_v47 = vld [vmem:[%s873_s23 + $0x1e8] sm:$0xff] }
  0x4b   : > { %456 = vst [vmem:[%s890_s16 + $0xe0] sm:$0xff] %v360_v31  ;;  %v289_v31 = vmax.f32 %v193_v23, 0.0  ;;  %v383_v36 = vmin.f32 %v287_v25, 1.0  ;;  %v202_v50 = vld [vmem:[%s873_s23 + $0x1f0] sm:$0xff]  ;;  %v203_v53 = vld [vmem:[%s873_s23 + $0x1f8] sm:$0xff]  ;;  %v204_v56 = vld [vmem:[%s873_s23 + $0x200] sm:$0xff] }
  0x4c   : > { %457 = vst [vmem:[%s890_s16 + $0xe8] sm:$0xff] %v361_v34  ;;  %v290_v34 = vmax.f32 %v194_v26, 0.0  ;;  %v384_v39 = vmin.f32 %v288_v28, 1.0  ;;  %v205_v59 = vld [vmem:[%s873_s23 + $0x208] sm:$0xff]  ;;  %v206_v62 = vld [vmem:[%s873_s23 + $0x210] sm:$0xff]  ;;  %v207_v1 = vld [vmem:[%s873_s23 + $0x218] sm:$0xff] }
  0x4d   : > { %458 = vst [vmem:[%s890_s16 + $0xf0] sm:$0xff] %v362_v37  ;;  %v291_v37 = vmax.f32 %v195_v29, 0.0  ;;  %v385_v42 = vmin.f32 %v289_v31, 1.0  ;;  %v208_v4 = vld [vmem:[%s873_s23 + $0x220] sm:$0xff]  ;;  %v209_v7 = vld [vmem:[%s873_s23 + $0x228] sm:$0xff]  ;;  %v210_v10 = vld [vmem:[%s873_s23 + $0x230] sm:$0xff] }
  0x4e   : > { %459 = vst [vmem:[%s890_s16 + $0xf8] sm:$0xff] %v363_v40  ;;  %v292_v40 = vmax.f32 %v196_v32, 0.0  ;;  %v386_v45 = vmin.f32 %v290_v34, 1.0  ;;  %v211_v13 = vld [vmem:[%s873_s23 + $0x238] sm:$0xff]  ;;  %v212_v16 = vld [vmem:[%s873_s23 + $0x240] sm:$0xff]  ;;  %v213_v19 = vld [vmem:[%s873_s23 + $0x248] sm:$0xff] }
  0x4f   : > { %460 = vst [vmem:[%s890_s16 + $0x100] sm:$0xff] %v364_v43  ;;  %v293_v43 = vmax.f32 %v197_v35, 0.0  ;;  %v387_v48 = vmin.f32 %v291_v37, 1.0  ;;  %v214_v22 = vld [vmem:[%s873_s23 + $0x250] sm:$0xff]  ;;  %v215_v25 = vld [vmem:[%s873_s23 + $0x258] sm:$0xff]  ;;  %v216_v28 = vld [vmem:[%s873_s23 + $0x260] sm:$0xff] }
  0x50   : > { %461 = vst [vmem:[%s890_s16 + $0x108] sm:$0xff] %v365_v46  ;;  %v294_v46 = vmax.f32 %v198_v38, 0.0  ;;  %v388_v51 = vmin.f32 %v292_v40, 1.0  ;;  %v217_v31 = vld [vmem:[%s873_s23 + $0x268] sm:$0xff]  ;;  %v218_v34 = vld [vmem:[%s873_s23 + $0x270] sm:$0xff]  ;;  %v219_v37 = vld [vmem:[%s873_s23 + $0x278] sm:$0xff] }
  0x51   : > { %462 = vst [vmem:[%s890_s16 + $0x110] sm:$0xff] %v366_v49  ;;  %v295_v49 = vmax.f32 %v199_v41, 0.0  ;;  %v389_v54 = vmin.f32 %v293_v43, 1.0  ;;  %v220_v40 = vld [vmem:[%s873_s23 + $0x280] sm:$0xff]  ;;  %v221_v43 = vld [vmem:[%s873_s23 + $0x288] sm:$0xff]  ;;  %s540_s28 = sshll.u32 %s537_s26, 4  ;;  %s541_s28 = int_to_ptr.hbm [resolvable:$true] %s540_s28 }
  0x52   : > { %463 = vst [vmem:[%s890_s16 + $0x118] sm:$0xff] %v367_v52  ;;  %v296_v52 = vmax.f32 %v200_v44, 0.0  ;;  %v390_v57 = vmin.f32 %v294_v46, 1.0  ;;  %v222_v46 = vld [vmem:[%s873_s23 + $0x290] sm:$0xff]  ;;  %s525_s29 = scalar_lea.sflag [#allocation4], %s869_s20  ;;  %s726_s30 = sshra.s32 %s541_s28, 4  ;;  %s727_s30 = int_to_ptr.hbm [resolvable:$true] %s726_s30 }
  0x53   : > { %464 = vst [vmem:[%s890_s16 + $0x120] sm:$0xff] %v368_v55  ;;  %v297_v55 = vmax.f32 %v201_v47, 0.0  ;;  %v391_v60 = vmin.f32 %v295_v49, 1.0  ;;  %v223_v49 = vld [vmem:[%s873_s23 + $0x298] sm:$0xff]  ;;  %s728_s2 = scalar_lea.hbm %s727_s30, 768  ;;  %s732_s5 = scalar_lea.hbm %s1107_s1, 6144 }
  0x54   : > { %465 = vst [vmem:[%s890_s16 + $0x128] sm:$0xff] %v369_v58  ;;  %v298_v58 = vmax.f32 %v202_v50, 0.0  ;;  %v392_v63 = vmin.f32 %v296_v52, 1.0  ;;  %v224_v52 = vld [vmem:[%s873_s23 + $0x2a0] sm:$0xff]  ;;  %p729_p6 = scmp.ne.s32.totalorder %s727_s30, %s728_s2  ;;  %p733_p1 = scmp.lt.s32.totalorder %s727_s30, %s1107_s1 }
  0x55   : > { %466 = vst [vmem:[%s890_s16 + $0x130] sm:$0xff] %v370_v61  ;;  %v299_v61 = vmax.f32 %v203_v53, 0.0  ;;  %v393_v2 = vmin.f32 %v297_v55, 1.0  ;;  %v225_v55 = vld [vmem:[%s873_s23 + $0x2a8] sm:$0xff]  ;;  %p734_p2 = scmp.lt.s32.totalorder %s732_s5, %s728_s2 }
  0x56   : > { %467 = vst [vmem:[%s890_s16 + $0x138] sm:$0xff] %v371_v0  ;;  %v300_v0 = vmax.f32 %v204_v56, 0.0  ;;  %v394_v5 = vmin.f32 %v298_v58, 1.0  ;;  %v226_v58 = vld [vmem:[%s873_s23 + $0x2b0] sm:$0xff]  ;;  %p730_p12 = pnand %p729_p6, %p839_p10 }
  0x57   : > { %468 = vst [vmem:[%s890_s16 + $0x140] sm:$0xff] %v372_v3  ;;  %v301_v3 = vmax.f32 %v205_v59, 0.0  ;;  %v395_v8 = vmin.f32 %v299_v61, 1.0  ;;  %v227_v61 = vld [vmem:[%s873_s23 + $0x2b8] sm:$0xff]  ;;  %p735_p3 = por %p734_p2, %p733_p1 }
  0x58   : > { %469 = vst [vmem:[%s890_s16 + $0x148] sm:$0xff] %v373_v6  ;;  %v302_v6 = vmax.f32 %v206_v62, 0.0  ;;  %v396_v11 = vmin.f32 %v300_v0, 1.0  ;;  %v228_v0 = vld [vmem:[%s873_s23 + $0x2c0] sm:$0xff]  ;;  %p731_p0 = pneg %p730_p12 }
  0x59   : > { %470 = vst [vmem:[%s890_s16 + $0x150] sm:$0xff] %v374_v9  ;;  %v303_v9 = vmax.f32 %v207_v1, 0.0  ;;  %v397_v14 = vmin.f32 %v301_v3, 1.0  ;;  %v229_v3 = vld [vmem:[%s873_s23 + $0x2c8] sm:$0xff] }
  0x5a   : > { %471 = vst [vmem:[%s890_s16 + $0x158] sm:$0xff] %v375_v12  ;;  %v304_v12 = vmax.f32 %v208_v4, 0.0  ;;  %v398_v17 = vmin.f32 %v302_v6, 1.0  ;;  %v230_v6 = vld [vmem:[%s873_s23 + $0x2d0] sm:$0xff]  ;;  %p736_p4 = pnand %p735_p3, %p731_p0 }
  0x5b   : > { %472 = vst [vmem:[%s890_s16 + $0x160] sm:$0xff] %v376_v15  ;;  %v305_v15 = vmax.f32 %v209_v7, 0.0  ;;  %v399_v20 = vmin.f32 %v303_v9, 1.0  ;;  %v231_v9 = vld [vmem:[%s873_s23 + $0x2d8] sm:$0xff] }
  0x5c   : > { %473 = vst [vmem:[%s890_s16 + $0x168] sm:$0xff] %v377_v18  ;;  %v306_v18 = vmax.f32 %v210_v10, 0.0  ;;  %v400_v23 = vmin.f32 %v304_v12, 1.0  ;;  %v232_v12 = vld [vmem:[%s873_s23 + $0x2e0] sm:$0xff] }
  0x5d   : > { %474 = vst [vmem:[%s890_s16 + $0x170] sm:$0xff] %v378_v21  ;;  %v307_v21 = vmax.f32 %v211_v13, 0.0  ;;  %v401_v26 = vmin.f32 %v305_v15, 1.0  ;;  %v233_v15 = vld [vmem:[%s873_s23 + $0x2e8] sm:$0xff] }
  0x5e   : > { %475 = vst [vmem:[%s890_s16 + $0x178] sm:$0xff] %v379_v24  ;;  %v308_v24 = vmax.f32 %v212_v16, 0.0  ;;  %v402_v29 = vmin.f32 %v306_v18, 1.0  ;;  %v234_v18 = vld [vmem:[%s873_s23 + $0x2f0] sm:$0xff] }
  0x5f   : > { %476 = vst [vmem:[%s890_s16 + $0x180] sm:$0xff] %v380_v27  ;;  %v309_v27 = vmax.f32 %v213_v19, 0.0  ;;  %v403_v32 = vmin.f32 %v307_v21, 1.0  ;;  %v235_v21 = vld [vmem:[%s873_s23 + $0x2f8] sm:$0xff] }
  0x60   : > { %477 = vst [vmem:[%s890_s16 + $0x188] sm:$0xff] %v381_v30  ;;  %v310_v30 = vmax.f32 %v214_v22, 0.0  ;;  %v404_v35 = vmin.f32 %v308_v24, 1.0 }
  0x61   : > { %478 = vst [vmem:[%s890_s16 + $0x190] sm:$0xff] %v382_v33  ;;  %v311_v33 = vmax.f32 %v215_v25, 0.0  ;;  %v405_v38 = vmin.f32 %v309_v27, 1.0  ;;  %v330_v25 = vmax.f32 %v234_v18, 0.0  ;;  %v331_v27 = vmax.f32 %v235_v21, 0.0 }
  0x62   : > { %479 = vst [vmem:[%s890_s16 + $0x198] sm:$0xff] %v383_v36  ;;  %v312_v36 = vmax.f32 %v216_v28, 0.0  ;;  %v406_v41 = vmin.f32 %v310_v30, 1.0 }
  0x63   : > { %480 = vst [vmem:[%s890_s16 + $0x1a0] sm:$0xff] %v384_v39  ;;  %v313_v39 = vmax.f32 %v217_v31, 0.0  ;;  %v407_v44 = vmin.f32 %v311_v33, 1.0  ;;  %v426_v30 = vmin.f32 %v330_v25, 1.0  ;;  %v427_v31 = vmin.f32 %v331_v27, 1.0 }
  0x64   : > { %481 = vst [vmem:[%s890_s16 + $0x1a8] sm:$0xff] %v385_v42  ;;  %v314_v42 = vmax.f32 %v218_v34, 0.0  ;;  %v408_v47 = vmin.f32 %v312_v36, 1.0 }
  0x65   : > { %482 = vst [vmem:[%s890_s16 + $0x1b0] sm:$0xff] %v386_v45  ;;  %v315_v45 = vmax.f32 %v219_v37, 0.0  ;;  %v409_v50 = vmin.f32 %v313_v39, 1.0 }
  0x66   : > { %483 = vst [vmem:[%s890_s16 + $0x1b8] sm:$0xff] %v387_v48  ;;  %v316_v48 = vmax.f32 %v220_v40, 0.0  ;;  %v410_v53 = vmin.f32 %v314_v42, 1.0 }
  0x67   : > { %484 = vst [vmem:[%s890_s16 + $0x1c0] sm:$0xff] %v388_v51  ;;  %v317_v51 = vmax.f32 %v221_v43, 0.0  ;;  %v411_v56 = vmin.f32 %v315_v45, 1.0 }
  0x68   : > { %485 = vst [vmem:[%s890_s16 + $0x1c8] sm:$0xff] %v389_v54  ;;  %v318_v54 = vmax.f32 %v222_v46, 0.0  ;;  %v412_v59 = vmin.f32 %v316_v48, 1.0 }
  0x69   : > { %486 = vst [vmem:[%s890_s16 + $0x1d0] sm:$0xff] %v390_v57  ;;  %v319_v57 = vmax.f32 %v223_v49, 0.0  ;;  %v413_v62 = vmin.f32 %v317_v51, 1.0 }
  0x6a   : > { %487 = vst [vmem:[%s890_s16 + $0x1d8] sm:$0xff] %v391_v60  ;;  %v320_v60 = vmax.f32 %v224_v52, 0.0  ;;  %v414_v1 = vmin.f32 %v318_v54, 1.0 }
  0x6b   : > { %488 = vst [vmem:[%s890_s16 + $0x1e0] sm:$0xff] %v392_v63  ;;  %v321_v63 = vmax.f32 %v225_v55, 0.0  ;;  %v415_v4 = vmin.f32 %v319_v57, 1.0 }
  0x6c   : > { %489 = vst [vmem:[%s890_s16 + $0x1e8] sm:$0xff] %v393_v2  ;;  %v322_v2 = vmax.f32 %v226_v58, 0.0  ;;  %v416_v7 = vmin.f32 %v320_v60, 1.0 }
  0x6d   : > { %490 = vst [vmem:[%s890_s16 + $0x1f0] sm:$0xff] %v394_v5  ;;  %v323_v5 = vmax.f32 %v227_v61, 0.0  ;;  %v417_v10 = vmin.f32 %v321_v63, 1.0 }
  0x6e   : > { %491 = vst [vmem:[%s890_s16 + $0x1f8] sm:$0xff] %v395_v8  ;;  %v324_v8 = vmax.f32 %v228_v0, 0.0  ;;  %v418_v13 = vmin.f32 %v322_v2, 1.0 }
  0x6f   : > { %492 = vst [vmem:[%s890_s16 + $0x200] sm:$0xff] %v396_v11  ;;  %v325_v11 = vmax.f32 %v229_v3, 0.0  ;;  %v419_v16 = vmin.f32 %v323_v5, 1.0 }
  0x70   : > { %493 = vst [vmem:[%s890_s16 + $0x208] sm:$0xff] %v397_v14  ;;  %v326_v14 = vmax.f32 %v230_v6, 0.0  ;;  %v420_v19 = vmin.f32 %v324_v8, 1.0 }
  0x71   : > { %494 = vst [vmem:[%s890_s16 + $0x210] sm:$0xff] %v398_v17  ;;  %v327_v17 = vmax.f32 %v231_v9, 0.0  ;;  %v421_v22 = vmin.f32 %v325_v11, 1.0 }
  0x72   : > { %495 = vst [vmem:[%s890_s16 + $0x218] sm:$0xff] %v399_v20  ;;  %v328_v20 = vmax.f32 %v232_v12, 0.0  ;;  %v422_v24 = vmin.f32 %v326_v14, 1.0 }
  0x73   : > { %496 = vst [vmem:[%s890_s16 + $0x220] sm:$0xff] %v400_v23  ;;  %v329_v23 = vmax.f32 %v233_v15, 0.0 }
  0x74   : > { %497 = vst [vmem:[%s890_s16 + $0x228] sm:$0xff] %v401_v26  ;;  %v423_v26 = vmin.f32 %v327_v17, 1.0  ;;  %v424_v28 = vmin.f32 %v328_v20, 1.0 }
  0x75   : > { %498 = vst [vmem:[%s890_s16 + $0x230] sm:$0xff] %v402_v29  ;;  %v425_v29 = vmin.f32 %v329_v23, 1.0 }
  0x76   : > { %499 = vst [vmem:[%s890_s16 + $0x238] sm:$0xff] %v403_v32 }
  0x77   : > { %500 = vst [vmem:[%s890_s16 + $0x240] sm:$0xff] %v404_v35 }
  0x78   : > { %501 = vst [vmem:[%s890_s16 + $0x248] sm:$0xff] %v405_v38 }
  0x79   : > { %502 = vst [vmem:[%s890_s16 + $0x250] sm:$0xff] %v406_v41 }
  0x7a   : > { %503 = vst [vmem:[%s890_s16 + $0x258] sm:$0xff] %v407_v44 }
  0x7b   : > { %504 = vst [vmem:[%s890_s16 + $0x260] sm:$0xff] %v408_v47 }
  0x7c   : > { %505 = vst [vmem:[%s890_s16 + $0x268] sm:$0xff] %v409_v50 }
  0x7d   : > { %506 = vst [vmem:[%s890_s16 + $0x270] sm:$0xff] %v410_v53 }
  0x7e   : > { %507 = vst [vmem:[%s890_s16 + $0x278] sm:$0xff] %v411_v56 }
  0x7f   : > { %508 = vst [vmem:[%s890_s16 + $0x280] sm:$0xff] %v412_v59 }
  0x80   : > { %509 = vst [vmem:[%s890_s16 + $0x288] sm:$0xff] %v413_v62 }
  0x81   : > { %510 = vst [vmem:[%s890_s16 + $0x290] sm:$0xff] %v414_v1 }
  0x82   : > { %511 = vst [vmem:[%s890_s16 + $0x298] sm:$0xff] %v415_v4 }
  0x83   : > { %512 = vst [vmem:[%s890_s16 + $0x2a0] sm:$0xff] %v416_v7 }
  0x84   : > { %513 = vst [vmem:[%s890_s16 + $0x2a8] sm:$0xff] %v417_v10 }
  0x85   : > { %514 = vst [vmem:[%s890_s16 + $0x2b0] sm:$0xff] %v418_v13 }
  0x86   : > { %515 = vst [vmem:[%s890_s16 + $0x2b8] sm:$0xff] %v419_v16 }
  0x87   : > { %516 = vst [vmem:[%s890_s16 + $0x2c0] sm:$0xff] %v420_v19 }
  0x88   : > { %517 = vst [vmem:[%s890_s16 + $0x2c8] sm:$0xff] %v421_v22 }
  0x89   : > { %518 = vst [vmem:[%s890_s16 + $0x2d0] sm:$0xff] %v422_v24 }
  0x8a   : > { %519 = vst [vmem:[%s890_s16 + $0x2d8] sm:$0xff] %v423_v26 }
  0x8b   : > { %520 = vst [vmem:[%s890_s16 + $0x2e0] sm:$0xff] %v424_v28 }
  0x8c   : > { %521 = vst [vmem:[%s890_s16 + $0x2e8] sm:$0xff] %v425_v29 }
  0x8d   : > { %522 = vst [vmem:[%s890_s16 + $0x2f0] sm:$0xff] %v426_v30 }
  0x8e   : > { %523 = vst [vmem:[%s890_s16 + $0x2f8] sm:$0xff] %v427_v31 }
  0x8f   : > { %739 = shalt.err (!%p736_p4)
}
  0x90   : > { %s782_s14 = smov 1024   ;;  %s783_s19 = smov 64  }
  0x91   : > { %634 = dma.vmem_to_hbm [thread:$0]  (%p839_p10), %s539_s27, 12288, %s541_s28, %s525_s29, %s782_s14, %s782_s14, %s783_s19  }
  0x92 PF: > { %p645_p5 = scmp.ge.s32.totalorder %s778_s9, 2  ;;  %s555_s20 = sand.u32 1, %s766_s6  }
  0x93   : > { %s556_s21 = scalar_lea.sflag [#allocation4], %s555_s20 }
  0x94   : > { %p641_p7 = pnand %p645_p5, %p843_p11 }
  0x96   : > { %p642_p8 = pneg %p641_p7 }
  0x98   : > { %761 = dma.done.wait (%p642_p8), %s556_s21, 12288  }
  0x99   : > { %763 = vsyncadd (%p642_p8), %s556_s21, 4294955008  ;;  %p14_p9 = scmp.ge.s32.totalorder %s819_s12, 10   ;;  %s1112_s6 = smov %s770_s7 }
  0x9a   : > { %s1113_s7 = smov %s774_s8  ;;  %s1114_s8 = smov %s831_s15 }
  0x9b   : > { %s1115_s9 = smov %s819_s12  ;;  %16 = sbr.rel (!%p14_p9) target bundleno = 5 (0x5), region = 69 }
  0xa0   :  { %562 = vsyncpa [#allocation3], 1 }
  0xa1   :  { %564 = vsyncpa [#allocation3 + $0x1], 1 }
  0xa2   :  { %565 = vsyncpa [#allocation4], 1 }
  0xa3   :  { %567 = vsyncpa [#allocation4 + $0x1], 1 }

</bundles_post_ra>
